<compile_context>
chip_gen: v5e
topology: v5e:2x2
jax: 0.10.0
libtpu: 0.0.40
codegen_flags: <defaults>
</compile_context>

<pallas_src>
import math
import functools

import jax
import jax.numpy as jnp
from jax import lax
from jax.experimental import pallas as pl
from jax.experimental.pallas import tpu as pltpu


# ----------------------------------------------------------------------------
# Kernel 1: fused QKV projection over (B*S) rows.
# ----------------------------------------------------------------------------
def _qkv_proj_kernel(x_ref, w_ref, b_ref, q_ref, k_ref, v_ref, *, d_pad):
    # x_ref: (tm, d_in) f32;  w_ref: (d_in, 3*d_pad) bf16;  b_ref: (1, 3*d_pad) f32
    # q/k/v_ref: (tm, d_pad) bf16.  Wq/bq already carry the 1/sqrt(d_out) scale.
    x = x_ref[...].astype(jnp.bfloat16)                     # bf16 MXU operand
    qkv = jnp.dot(x, w_ref[...], preferred_element_type=jnp.float32) + b_ref[...]
    # 128-aligned lane splits (d_pad is a multiple of 128): free.
    q_ref[...] = qkv[:, 0 * d_pad:1 * d_pad].astype(q_ref.dtype)
    k_ref[...] = qkv[:, 1 * d_pad:2 * d_pad].astype(k_ref.dtype)
    v_ref[...] = qkv[:, 2 * d_pad:3 * d_pad].astype(v_ref.dtype)


# ----------------------------------------------------------------------------
# Kernel 2: flash-style causal attention with online softmax.
# ----------------------------------------------------------------------------
def _flash_causal_kernel(q_ref, k_ref, v_ref, o_ref, m_sc, l_sc, acc_sc, *, tq, tk):
    qi = pl.program_id(1)
    ki = pl.program_id(2)
    nk = pl.num_programs(2)

    q_start = qi * tq
    kv_start = ki * tk

    @pl.when(ki == 0)
    def _():
        # Finite "-inf": ki==0 always contains unmasked columns (col 0 <= row),
        # so m/l become finite/positive before finalize; no all-masked row.
        m_sc[...] = jnp.full_like(m_sc, -1e30)
        l_sc[...] = jnp.zeros_like(l_sc)
        acc_sc[...] = jnp.zeros_like(acc_sc)

    # Skip KV tiles lying entirely above the diagonal (fully masked): this
    # halves exp (EUP) and MXU work for causal attention.
    @pl.when(kv_start < q_start + tq)
    def _():
        q = q_ref[0]                                        # (tq, d_pad) bf16, pre-scaled
        k = k_ref[0]                                        # (tk, d_pad) bf16
        s = lax.dot_general(q, k, (((1,), (1,)), ((), ())),
                            preferred_element_type=jnp.float32)   # (tq, tk) f32

        # Causal mask via in-kernel iota.  On fully-unmasked interior tiles the
        # predicate is all-true, so this is a single cheap VPU select (the
        # expensive fully-masked tiles were already skipped above).
        row = q_start + lax.broadcasted_iota(jnp.int32, (tq, tk), 0)
        col = kv_start + lax.broadcasted_iota(jnp.int32, (tq, tk), 1)
        s = jnp.where(col <= row, s, jnp.float32(-1e30))

        # Online softmax update (all f32 on the VPU/EUP).
        m_prev = m_sc[...]
        m_new = jnp.maximum(m_prev, jnp.max(s, axis=-1, keepdims=True))
        alpha = jnp.exp(m_prev - m_new)
        p = jnp.exp(s - m_new)
        l_sc[...] = alpha * l_sc[...] + jnp.sum(p, axis=-1, keepdims=True)
        acc_sc[...] = alpha * acc_sc[...] + jnp.dot(
            p.astype(jnp.bfloat16), v_ref[0], preferred_element_type=jnp.float32)
        m_sc[...] = m_new

    @pl.when(ki == nk - 1)
    def _():
        # Normalize once after the PV accumulation (no (S,S) attn matrix).
        inv_l = pl.reciprocal(l_sc[...], approx=True)
        o_ref[0] = (acc_sc[...] * inv_l).astype(o_ref.dtype)


# ----------------------------------------------------------------------------
# Wrapper
# ----------------------------------------------------------------------------
def _pick_tile(n, preferred):
    """Largest tile <= preferred that divides n and is a multiple of 8 (or n)."""
    if n <= preferred:
        return n
    t = (preferred // 8) * 8
    while t >= 8:
        if n % t == 0:
            return t
        t -= 8
    return n


def masked_self_attention(x, wq, wk, wv, bq, bk, bv, context_length, *,
                          q_tile=256, kv_tile=256, proj_rows=512):
    """x: (B, S, d_in); w*: (d_in, d_out); b*: (d_out,).  Returns (B, S, d_out) f32.

    Default tq=tk=256 fits v7x's 64 MiB VMEM comfortably; on v6e tiles of 512
    amortize grid overhead further, on v5e 128-multiples already saturate its
    4x128^2 MXU -- all are valid via the keyword args.
    """
    B, S, d_in = x.shape
    d_out = wq.shape[1]
    assert S <= context_length
    scale = 1.0 / math.sqrt(d_out)

    # Pad head dim to a multiple of 128 lanes (lane-dense stores, aligned splits).
    d_pad = ((d_out + 127) // 128) * 128

    def pad_w(w):
        return jnp.pad(w, ((0, 0), (0, d_pad - d_out)))

    def pad_b(b):
        return jnp.pad(b, (0, d_pad - d_out))

    # Fold 1/sqrt(d_out) into the Q projection; fuse [Wq|Wk|Wv]; bf16 weights.
    w_fused = jnp.concatenate([pad_w(wq) * scale, pad_w(wk), pad_w(wv)], axis=1)
    w_fused = w_fused.astype(jnp.bfloat16)                       # (d_in, 3*d_pad)
    b_fused = jnp.concatenate([pad_b(bq) * scale, pad_b(bk), pad_b(bv)])
    b_fused = b_fused.reshape(1, 3 * d_pad).astype(jnp.float32)

    # ---- Kernel 1: fused QKV projection over flattened rows -----------------
    M = B * S
    tm = _pick_tile(M, proj_rows)
    x2 = x.reshape(M, d_in)

    proj_cost = pl.CostEstimate(
        flops=2 * M * d_in * 3 * d_pad,
        transcendentals=0,
        bytes_accessed=M * d_in * 4 + d_in * 3 * d_pad * 2
                       + 3 * d_pad * 4 + 3 * M * d_pad * 2)

    q, k, v = pl.pallas_call(
        functools.partial(_qkv_proj_kernel, d_pad=d_pad),
        out_shape=tuple(jax.ShapeDtypeStruct((M, d_pad), jnp.bfloat16)
                        for _ in range(3)),
        grid_spec=pltpu.PrefetchScalarGridSpec(
            num_scalar_prefetch=0,
            grid=(M // tm,),
            in_specs=[
                pl.BlockSpec((tm, d_in), lambda i: (i, 0)),          # x rows
                pl.BlockSpec((d_in, 3 * d_pad), lambda i: (0, 0)),   # fused W
                pl.BlockSpec((1, 3 * d_pad), lambda i: (0, 0)),      # fused b
            ],
            out_specs=[
                pl.BlockSpec((tm, d_pad), lambda i: (i, 0)),
                pl.BlockSpec((tm, d_pad), lambda i: (i, 0)),
                pl.BlockSpec((tm, d_pad), lambda i: (i, 0)),
            ],
        ),
        compiler_params=pltpu.CompilerParams(
            dimension_semantics=("parallel",),
            vmem_limit_bytes=48 * 1024 * 1024),
        cost_estimate=proj_cost,
    )(x2, w_fused, b_fused)

    q = q.reshape(B, S, d_pad)
    k = k.reshape(B, S, d_pad)
    v = v.reshape(B, S, d_pad)

    # ---- Kernel 2: flash causal attention -----------------------------------
    tq = _pick_tile(S, q_tile)
    tk = _pick_tile(S, kv_tile)
    n_q, n_k = S // tq, S // tk

    flash_cost = pl.CostEstimate(
        flops=2 * B * S * S * d_pad,              # QK^T + PV, ~halved by causal skip
        transcendentals=B * S * S // 2,
        bytes_accessed=3 * B * S * d_pad * 2 + B * S * d_pad * 4)

    out = pl.pallas_call(
        functools.partial(_flash_causal_kernel, tq=tq, tk=tk),
        out_shape=jax.ShapeDtypeStruct((B, S, d_pad), jnp.float32),
        grid_spec=pltpu.PrefetchScalarGridSpec(
            num_scalar_prefetch=0,
            grid=(B, n_q, n_k),
            in_specs=[
                pl.BlockSpec((1, tq, d_pad), lambda b, qi, ki: (b, qi, 0)),  # q
                pl.BlockSpec((1, tk, d_pad), lambda b, qi, ki: (b, ki, 0)),  # k
                pl.BlockSpec((1, tk, d_pad), lambda b, qi, ki: (b, ki, 0)),  # v
            ],
            out_specs=pl.BlockSpec((1, tq, d_pad), lambda b, qi, ki: (b, qi, 0)),
            scratch_shapes=[
                pltpu.VMEM((tq, 1), jnp.float32),      # running max m
                pltpu.VMEM((tq, 1), jnp.float32),      # running denom l
                pltpu.VMEM((tq, d_pad), jnp.float32),  # running numerator acc
            ],
        ),
        compiler_params=pltpu.CompilerParams(
            dimension_semantics=("parallel", "parallel", "arbitrary"),
            vmem_limit_bytes=48 * 1024 * 1024),
        cost_estimate=flash_cost,
    )(q, k, v)

    # Drop the lane padding back to d_out.  Dropout == identity (eval mode).
    return out[:, :, :d_out]


# ----------------------------------------------------------------------------
# Pure-JAX reference (intended causal semantics) and demo
# ----------------------------------------------------------------------------
def _reference(x, wq, wk, wv, bq, bk, bv):
    d_out = wq.shape[1]
    scale = 1.0 / math.sqrt(d_out)
    q = x @ wq + bq
    k = x @ wk + bk
    v = x @ wv + bv
    s = jnp.einsum("bqd,bkd->bqk", q, k) * scale
    S = x.shape[1]
    causal = jnp.tril(jnp.ones((S, S), dtype=bool))
    s = jnp.where(causal[None], s, -jnp.inf)
    w = jax.nn.softmax(s, axis=-1)
    return jnp.einsum("bqk,bkd->bqd", w, v)


if __name__ == "__main__":
    d_in, d_out_dim = 32, 16
    B, S, context_length = 2, 8, 8

    key = jax.random.PRNGKey(0)
    kx, kq, kk, kv, kbq, kbk, kbv = jax.random.split(key, 7)

    x = jax.random.normal(kx, (B, S, d_in), dtype=jnp.float32)

    # Deterministic nn.Linear-style init, stored transposed as (d_in, d_out)
    # so the kernel computes x @ W + b.
    bound = 1.0 / math.sqrt(d_in)
    wq = jax.random.uniform(kq, (d_in, d_out_dim), jnp.float32, -bound, bound)
    wk = jax.random.uniform(kk, (d_in, d_out_dim), jnp.float32, -bound, bound)
    wv = jax.random.uniform(kv, (d_in, d_out_dim), jnp.float32, -bound, bound)
    bq = jax.random.uniform(kbq, (d_out_dim,), jnp.float32, -bound, bound)
    bk = jax.random.uniform(kbk, (d_out_dim,), jnp.float32, -bound, bound)
    bv = jax.random.uniform(kbv, (d_out_dim,), jnp.float32, -bound, bound)

    out = masked_self_attention(x, wq, wk, wv, bq, bk, bv, context_length)
    out = jax.block_until_ready(out)

    ref = _reference(x, wq, wk, wv, bq, bk, bv)
    assert out.shape == (B, S, d_out_dim)
    # Tolerance loosened intentionally: bf16 MXU operands (projection, QK^T, PV)
    # and approx reciprocal => softmax rows sum to 1 only to ~1e-3 relative.
    assert jnp.allclose(out, ref, atol=3e-2, rtol=3e-2), "mismatch vs reference"

    print("KERNEL_OK")
</pallas_src>

<mosaic_0001>
module attributes {stable_mosaic.version = 11 : i64} {
  func.func @_qkv_proj_kernel(%arg0: i32, %arg1: memref<16x32xf32, #tpu.memory_space<vmem>>, %arg2: memref<32x384xbf16, #tpu.memory_space<vmem>>, %arg3: memref<1x384xf32, #tpu.memory_space<vmem>>, %arg4: memref<16x128xbf16, #tpu.memory_space<vmem>>, %arg5: memref<16x128xbf16, #tpu.memory_space<vmem>>, %arg6: memref<16x128xbf16, #tpu.memory_space<vmem>>) attributes {dimension_semantics = [#tpu.dimension_semantics<parallel>], iteration_bounds = array<i64: 1>, scalar_prefetch = 0 : i64, scratch_operands = 0 : i64, tpu.core_type = #tpu.core_type<tc>, window_params = [{transform_indices = @transform_0, window_bounds = array<i64: 16, 32>}, {pipeline_mode = #tpu.pipeline_mode<synchronous>, transform_indices = @transform_1, window_bounds = array<i64: 32, 384>}, {pipeline_mode = #tpu.pipeline_mode<synchronous>, transform_indices = @transform_2, window_bounds = array<i64: 1, 384>}, {transform_indices = @transform_3, window_bounds = array<i64: 16, 128>}, {transform_indices = @transform_4, window_bounds = array<i64: 16, 128>}, {transform_indices = @transform_5, window_bounds = array<i64: 16, 128>}]} {
    %c0 = arith.constant 0 : index
    %c0_0 = arith.constant 0 : index
    %0 = vector.load %arg1[%c0, %c0_0] : memref<16x32xf32, #tpu.memory_space<vmem>>, vector<16x32xf32>
    %1 = arith.truncf %0 : vector<16x32xf32> to vector<16x32xbf16>
    %c0_1 = arith.constant 0 : index
    %c0_2 = arith.constant 0 : index
    %2 = vector.load %arg2[%c0_1, %c0_2] : memref<32x384xbf16, #tpu.memory_space<vmem>>, vector<32x384xbf16>
    %cst = arith.constant dense<0.000000e+00> : vector<16x384xf32>
    %3 = tpu.matmul %1, %2, %cst {dimension_numbers = #tpu.dot_dimension_numbers<[1], [0], [0], [1], [0, 0, 1, 1], [], []>} : vector<16x32xbf16>, vector<32x384xbf16>, vector<16x384xf32> -> vector<16x384xf32>
    %c0_3 = arith.constant 0 : index
    %c0_4 = arith.constant 0 : index
    %4 = vector.load %arg3[%c0_3, %c0_4] : memref<1x384xf32, #tpu.memory_space<vmem>>, vector<1x384xf32>
    %5 = vector.broadcast %4 : vector<1x384xf32> to vector<16x384xf32>
    %6 = arith.addf %3, %5 : vector<16x384xf32>
    %7 = vector.extract_strided_slice %6 {offsets = [0, 0], sizes = [16, 128], strides = [1, 1]} : vector<16x384xf32> to vector<16x128xf32>
    %8 = arith.truncf %7 : vector<16x128xf32> to vector<16x128xbf16>
    %c0_5 = arith.constant 0 : index
    %c0_6 = arith.constant 0 : index
    %9 = vector.load %arg4[%c0_5, %c0_6] : memref<16x128xbf16, #tpu.memory_space<vmem>>, vector<16x128xbf16>
    tpu.vector_store %arg4[%c0_5, %c0_6], %8 {strides = array<i32>} : memref<16x128xbf16, #tpu.memory_space<vmem>>, vector<16x128xbf16>,
    %10 = vector.extract_strided_slice %6 {offsets = [0, 128], sizes = [16, 128], strides = [1, 1]} : vector<16x384xf32> to vector<16x128xf32>
    %11 = arith.truncf %10 : vector<16x128xf32> to vector<16x128xbf16>
    %c0_7 = arith.constant 0 : index
    %c0_8 = arith.constant 0 : index
    %12 = vector.load %arg5[%c0_7, %c0_8] : memref<16x128xbf16, #tpu.memory_space<vmem>>, vector<16x128xbf16>
    tpu.vector_store %arg5[%c0_7, %c0_8], %11 {strides = array<i32>} : memref<16x128xbf16, #tpu.memory_space<vmem>>, vector<16x128xbf16>,
    %13 = vector.extract_strided_slice %6 {offsets = [0, 256], sizes = [16, 128], strides = [1, 1]} : vector<16x384xf32> to vector<16x128xf32>
    %14 = arith.truncf %13 : vector<16x128xf32> to vector<16x128xbf16>
    %c0_9 = arith.constant 0 : index
    %c0_10 = arith.constant 0 : index
    %15 = vector.load %arg6[%c0_9, %c0_10] : memref<16x128xbf16, #tpu.memory_space<vmem>>, vector<16x128xbf16>
    tpu.vector_store %arg6[%c0_9, %c0_10], %14 {strides = array<i32>} : memref<16x128xbf16, #tpu.memory_space<vmem>>, vector<16x128xbf16>,
    return
  }
  func.func @transform_0(%arg0: i32) -> (i32, i32) {
    %c0_i32 = arith.constant 0 : i32
    %c0_i32_0 = arith.constant 0 : i32
    return %arg0, %c0_i32 : i32, i32
  }
  func.func @transform_1(%arg0: i32) -> (i32, i32) {
    %c0_i32 = arith.constant 0 : i32
    %c0_i32_0 = arith.constant 0 : i32
    %c0_i32_1 = arith.constant 0 : i32
    return %c0_i32, %c0_i32_0 : i32, i32
  }
  func.func @transform_2(%arg0: i32) -> (i32, i32) {
    %c0_i32 = arith.constant 0 : i32
    %c0_i32_0 = arith.constant 0 : i32
    %c0_i32_1 = arith.constant 0 : i32
    return %c0_i32, %c0_i32_0 : i32, i32
  }
  func.func @transform_3(%arg0: i32) -> (i32, i32) {
    %c0_i32 = arith.constant 0 : i32
    %c0_i32_0 = arith.constant 0 : i32
    return %arg0, %c0_i32 : i32, i32
  }
  func.func @transform_4(%arg0: i32) -> (i32, i32) {
    %c0_i32 = arith.constant 0 : i32
    %c0_i32_0 = arith.constant 0 : i32
    return %arg0, %c0_i32 : i32, i32
  }
  func.func @transform_5(%arg0: i32) -> (i32, i32) {
    %c0_i32 = arith.constant 0 : i32
    %c0_i32_0 = arith.constant 0 : i32
    return %arg0, %c0_i32 : i32, i32
  }
}

</mosaic_0001>

<bundles_post_ra>
// kernel: tpu_custom_call.1
= control target key start
LH: loop header
LB: loop body
LE: loop exit
PB: predicated region body
PF: predicated region fallthrough
CT: control target
= control target key end

     0   :  { %11 = vsyncpa [#allocation3], 0  ;;  %s504_s0 = inlined_call_operand.hbm [shape: f32[16,32], index: 0, kind: input, shape index: {}]   ;;  %s505_s1 = inlined_call_operand.hbm [shape: bf16[32,384], index: 1, kind: input, shape index: {}]   ;;  %s506_s2 = inlined_call_operand.hbm [shape: f32[1,384], index: 2, kind: input, shape index: {}]   ;;  %s507_s3 = inlined_call_operand.hbm [shape: bf16[16,128], index: 3, kind: output, shape index: {0}]   ;;  %s508_s4 = inlined_call_operand.hbm [shape: bf16[16,128], index: 4, kind: output, shape index: {1}]   ;;  %s509_s5 = inlined_call_operand.hbm [shape: bf16[16,128], index: 5, kind: output, shape index: {2}]  }
   0x1   :  { %12 = vsyncpa [#allocation6], 0 }
   0x2   :  { %13 = vsyncpa [#allocation4], 0  ;;  %s32_s20 = sshll.u32 %s505_s1, 4  ;;  %s33_s20 = int_to_ptr.hbm [resolvable:$true] %s32_s20 }
   0x3   :  { %14 = vsyncpa [#allocation10], 0  ;;  %s441_s21 = smov [#allocation5]   ;;  %s19_s25 = sshll.u32 %s504_s0, 4  ;;  %s20_s25 = int_to_ptr.hbm [resolvable:$true] %s19_s25 }
   0x4   :  { %s34_s22 = sshll.u32 %s441_s21, 4  ;;  %s442_s26 = smov 192   ;;  %s35_s22 = int_to_ptr.vmem [resolvable:$true] %s34_s22 }
   0x5   :  { %s443_s27 = smov 12   ;;  %s444_s28 = smov [#allocation2]  }
   0x6   :  { %40 = dma.hbm_to_vmem [thread:$0]  %s33_s20, 768, %s35_s22, [#allocation6], %s442_s26, %s442_s26, %s443_s27  }
   0x7   :  { %s21_s29 = sshll.u32 %s444_s28, 4  ;;  %s445_s30 = smov 128   ;;  %s22_s29 = int_to_ptr.vmem [resolvable:$true] %s21_s29 }
   0x8   :  { %s446_s6 = smov 8   ;;  %s46_s8 = sshll.u32 %s506_s2, 4  ;;  %s47_s8 = int_to_ptr.hbm [resolvable:$true] %s46_s8 }
   0x9   :  { %27 = dma.hbm_to_vmem [thread:$0]  %s20_s25, 256, %s22_s29, [#allocation3], %s445_s30, %s445_s30, %s446_s6  }
   0xa   :  { %s447_s9 = smov [#allocation7]  }
   0xb   :  { %s48_s10 = sshll.u32 %s447_s9, 4  ;;  %s49_s10 = int_to_ptr.vmem [resolvable:$true] %s48_s10 }
   0xc   :  { %51 = dma.hbm_to_vmem [thread:$0]  %s47_s8, 48, %s49_s10, [#allocation6]  }
   0xd   :  { %433 = dma.done.wait [#allocation3], 256  }
   0xe   :  { %434 = vsyncadd [#allocation3], 4294967040 }
   0xf   :  { %435 = dma.done.wait [#allocation6], 816  }
  0x10   :  { %436 = vsyncadd [#allocation6], 4294966480  ;;  %v243_v0 = vld [vmem:[#allocation5 + $0x18] sm:$0xf]  ;;  %v260_v1 = vld [vmem:[#allocation5 + $0x20] sm:$0xf0] }
  0x11   :  { %v259_v2 = vld [vmem:[#allocation5 + $0x1c] sm:$0xf]  ;;  %v244_v3 = vor.u32 %v260_v1, %v243_v0  ;;  %v245_v4 = vld [vmem:[#allocation5 + $0x24] sm:$0xf0]  ;;  %v251_v5 = vld [vmem:[#allocation5 + $0x20] sm:$0xf] }
  0x12   :  { %v261_v6 = vld [vmem:[#allocation5 + $0x28] sm:$0xf0]  ;;  %v248_v7 = vor.u32 %v259_v2, %v245_v4  ;;  %v231_v9 = vld [vmem:[#allocation5] sm:$0xf]  ;;  %v256_v11 = vld [vmem:[#allocation5 + $0x4] sm:$0xf] }
  0x13   :  { %v252_v8 = vor.u32 %v261_v6, %v251_v5  ;;  %v257_v10 = vld [vmem:[#allocation5 + $0x8] sm:$0xf0]  ;;  %126 = vmatpush.bf16.msra.mxu0 %v244_v3  ;;  %v233_v13 = vld [vmem:[#allocation5 + $0xc] sm:$0xf0]  ;;  %v239_v14 = vld [vmem:[#allocation5 + $0x8] sm:$0xf] }
  0x14   :  { %v232_v12 = vor.u32 %v257_v10, %v231_v9  ;;  %v258_v15 = vld [vmem:[#allocation5 + $0x10] sm:$0xf0]  ;;  %140 = vmatpush.bf16.msra.mxu1 %v248_v7  ;;  %v236_v16 = vor.u32 %v256_v11, %v233_v13  ;;  %v66_v19 = vld [vmem:[#allocation2 + $0x8] sm:$0xff]  ;;  %vm116_vm0 = vcmask 261120   ;;  %v76_v23 = vld [vmem:[#allocation7] sm:$0x7] }
  0x15   :  { %154 = vmatpush.bf16.msra.mxu2 %v252_v8  ;;  %v240_v17 = vor.u32 %v258_v15, %v239_v14  ;;  %v65_v18 = vld [vmem:[#allocation2] sm:$0xff]  ;;  %v78_v24 = vperm.slane %v76_v23, 0  ;;  %v79_v25 = vperm.slane %v76_v23, 1  ;;  %s448_s0 = smov [#allocation9]   ;;  %s449_s11 = smov [#allocation8]   ;;  %v80_v34 = vperm.slane %v76_v23, 2 }
  0x16   :  { %v67_v20 = vpack.c.bf16 %v66_v19, %v65_v18  ;;  %s492_s2 = sshll.u32 %s448_s0, 4  ;;  %s178_s12 = sshll.u32 %s449_s11, 4  ;;  %s179_s12 = int_to_ptr.vmem [resolvable:$true] %s178_s12  ;;  %s192_s2 = int_to_ptr.vmem [resolvable:$true] %s492_s2 }
  0x17   :  { %127 = vmatpush.bf16.msra.mxu0 %v232_v12  ;;  %s180_s15 = sshll.u32 %s507_s3, 4  ;;  %s193_s18 = sshll.u32 %s508_s4, 4  ;;  %s181_s15 = int_to_ptr.hbm [resolvable:$true] %s180_s15  ;;  %s194_s18 = int_to_ptr.hbm [resolvable:$true] %s193_s18 }
  0x18   :  { %141 = vmatpush.bf16.msra.mxu1 %v236_v16  ;;  %s450_s19 = smov [#allocation11]   ;;  %s206_s22 = sshll.u32 %s509_s5, 4  ;;  %s207_s22 = int_to_ptr.hbm [resolvable:$true] %s206_s22 }
  0x19   :  { %155 = vmatpush.bf16.msra.mxu2 %v240_v17  ;;  %s204_s20 = sshll.u32 %s450_s19, 4  ;;  %s451_s23 = smov 64   ;;  %s205_s20 = int_to_ptr.vmem [resolvable:$true] %s204_s20 }
  0x1a   :  { %253 = vmatmul.msk.bf16.vlgmr.msra.gmra.mxu0 %vm116_vm0, %v67_v20  ;;  %s452_s24 = smov 4  }
  0x1b   :  { %254 = vmatmul.msk.bf16.vlgmr.msra.gmra.mxu1 %vm116_vm0, %v67_v20 }
  0x1c   :  { %255 = vmatmul.msk.bf16.vlgmr.msra.gmra.mxu2 %vm116_vm0, %v67_v20 }
  0x97   :  { %v129_v21 = vpop.f32.mrf.mxu0 }
  0x98   :  { %v143_v22 = vpop.f32.mrf.mxu1  ;;  %v130_v28 = vadd.f32 %v129_v21, %v78_v24 }
  0x99   :  { %v144_v31 = vadd.f32 %v143_v22, %v79_v25 }
  0x9f   :  { %v157_v26 = vpop.f32.mrf.mxu2  ;;  %v131_v27 = vpop.f32.mrf.mxu0 }
  0xa0   :  { %v132_v29 = vadd.f32 %v131_v27, %v78_v24  ;;  %v145_v30 = vpop.f32.mrf.mxu1  ;;  %v158_v37 = vadd.f32 %v157_v26, %v80_v34 }
  0xa1   :  { %v146_v32 = vadd.f32 %v145_v30, %v79_v25 }
  0xa2   :  { %v265_v33 = vpack.c.bf16 %v132_v29, %v130_v28 }
  0xa3   :  { %v270_v35 = vpack.c.bf16 %v146_v32, %v144_v31 }
  0xa4   :  { %266 = vst [vmem:[#allocation8] sm:$0xff] %v265_v33  }
  0xa5   :  { %271 = vst [vmem:[#allocation9] sm:$0xff] %v270_v35   ;;  %186 = dma.vmem_to_hbm [thread:$0]  %s179_s12, 128, %s181_s15, [#allocation4], %s451_s23, %s451_s23, %s452_s24  }
  0xa6   :  { %199 = dma.vmem_to_hbm [thread:$0]  %s192_s2, 128, %s194_s18, [#allocation10], %s451_s23, %s451_s23, %s452_s24  }
  0xa7   :  { %v159_v36 = vpop.f32.mrf.mxu2 }
  0xa8   :  { %v160_v38 = vadd.f32 %v159_v36, %v80_v34 }
  0xaa   :  { %v275_v39 = vpack.c.bf16 %v160_v38, %v158_v37 }
  0xac   :  { %276 = vst [vmem:[#allocation11] sm:$0xff] %v275_v39  }
  0xad   :  { %212 = dma.vmem_to_hbm [thread:$0]  %s205_s20, 128, %s207_s22, [#allocation10], %s451_s23, %s451_s23, %s452_s24  }
  0xae   :  { %437 = dma.done.wait [#allocation4], 128  }
  0xaf   :  { %438 = vsyncadd [#allocation4], 4294967168 }
  0xb0   :  { %439 = dma.done.wait [#allocation10], 256  }
  0xb1   :  { %440 = vsyncadd [#allocation10], 4294967040 }
  0xb2   :  { %225 = vsyncpa [#allocation3], 1 }
  0xb3   :  { %226 = vsyncpa [#allocation6], 1 }
  0xb4   :  { %227 = vsyncpa [#allocation4], 1 }
  0xb5   :  { %228 = vsyncpa [#allocation10], 1 }

</bundles_post_ra>
